<compile_context>
chip_gen: v5e
topology: v5e:2x2
jax: 0.10.0
libtpu: 0.0.40
codegen_flags: <defaults>
</compile_context>

<pallas_src>
import math

import jax
import jax.numpy as jnp
from jax.experimental import pallas as pl
from jax.experimental.pallas import tpu as pltpu


# ----------------------------------------------------------------------------
# Fused forward kernel (encoder + folded task head/biaffine + cross-entropy)
# ----------------------------------------------------------------------------
def _layernorm(x, g, b, eps=1e-5):
    mu = jnp.mean(x, axis=-1, keepdims=True)
    var = jnp.mean((x - mu) ** 2, axis=-1, keepdims=True)
    return (x - mu) * jax.lax.rsqrt(var + eps) * g + b


def _fused_forward_kernel(
    h0_ref, maskadd_ref, ysel_ref,
    ln0_g_ref, ln0_b_ref,
    wqkv_ref, bqkv_ref, wo_ref, bo_ref,
    ln1_g_ref, ln1_b_ref,
    w1_ref, b1_ref, w2_ref, b2_ref,
    ln2_g_ref, ln2_b_ref,
    acat_ref, ccat_ref, k2_ref, r2_ref,
    logits_ref, loss_ref,
):
    B, S, H = h0_ref.shape
    f32 = jnp.float32

    # ---- encoder (synthetic PLM) -------------------------------------------
    x = h0_ref[...].reshape(B * S, H)                                 # (BS, H)
    h = _layernorm(x, ln0_g_ref[...], ln0_b_ref[...])

    # fused QKV projection: one (H, 3H) matmul
    qkv = jnp.dot(h, wqkv_ref[...], preferred_element_type=f32) + bqkv_ref[...]
    q = qkv[:, :H].reshape(B, S, H)
    k = qkv[:, H:2 * H].reshape(B, S, H)
    v = qkv[:, 2 * H:].reshape(B, S, H)

    s = jnp.einsum("bqd,bkd->bqk", q, k, preferred_element_type=f32)
    s = s * (1.0 / math.sqrt(H)) + maskadd_ref[...]                   # additive {0,-1e9}
    s = s - jnp.max(s, axis=-1, keepdims=True)
    p = jnp.exp(s)
    # NOTE: approx reciprocal (EUP) -> ~1e-3 rel. deviation vs exact softmax.
    p = p * pl.reciprocal(jnp.sum(p, axis=-1, keepdims=True), approx=True)
    a = jnp.einsum("bqk,bkd->bqd", p, v, preferred_element_type=f32).reshape(B * S, H)
    a = jnp.dot(a, wo_ref[...], preferred_element_type=f32) + bo_ref[...]

    h = _layernorm(a + h, ln1_g_ref[...], ln1_b_ref[...])

    # fused FFN (w1 + GELU + w2)
    ff = jnp.dot(h, w1_ref[...], preferred_element_type=f32) + b1_ref[...]
    ff = jax.nn.gelu(ff, approximate=True)
    ff = jnp.dot(ff, w2_ref[...], preferred_element_type=f32) + b2_ref[...]
    h = _layernorm(ff + h, ln2_g_ref[...], ln2_b_ref[...])            # (BS, H)
    h3 = h.reshape(B, S, H)

    # ---- task head + biaffine, fully folded ---------------------------------
    #   logits[b,o,x,y] = (h_x @ A_o + r_o) . h_y + h_x . c_o + k_o
    t = jnp.dot(h, acat_ref[...], preferred_element_type=f32)         # (BS, 2H)
    cc = jnp.dot(h, ccat_ref[...], preferred_element_type=f32) + k2_ref[...]  # (BS, 2)
    r = r2_ref[...]                                                   # (2, H)

    # both channels stacked along the row (sublane) dim -> ONE batched einsum
    tL = jnp.concatenate(
        [(t[:, :H] + r[0:1, :]).reshape(B, S, H),
         (t[:, H:] + r[1:2, :]).reshape(B, S, H)], axis=1)            # (B, 2S, H)
    core = jnp.einsum("bxj,byj->bxy", tL, h3, preferred_element_type=f32)  # (B, 2S, S)

    bias2 = jnp.concatenate(
        [cc[:, 0:1].reshape(B, S, 1), cc[:, 1:2].reshape(B, S, 1)], axis=1)  # (B, 2S, 1)
    full = core + bias2
    # direct write of the whole slab; wrapper reshape to (B,2,S,S) is free metadata
    logits_ref[...] = full

    # ---- cross entropy over the size-2 channel axis (on the resident slab) ---
    l0 = full[:, :S, :]                                               # (B, S, S)
    l1 = full[:, S:, :]
    m = jnp.maximum(l0, l1)
    lse = m + jnp.log(jnp.exp(l0 - m) + jnp.exp(l1 - m))
    picked = l0 + ysel_ref[...] * (l1 - l0)                           # arithmetic select
    # NOTE: averages over all B*S*S positions (no padding mask), matching the spec.
    loss_ref[0, 0] = jnp.sum(lse - picked) * (1.0 / float(B * S * S))


# ----------------------------------------------------------------------------
# Parameters, one-time packing, and forward wrapper
# ----------------------------------------------------------------------------
def init_params(key, vocab=64, hidden=32, ffn=128, max_pos=16, n_out=2):
    ks = jax.random.split(key, 16)
    g = lambda k, shape, s=0.02: (s * jax.random.normal(k, shape)).astype(jnp.float32)
    H = hidden
    return {
        "emb": g(ks[0], (vocab, H)),
        "pos": g(ks[1], (max_pos, H)),
        "ln0_g": jnp.ones((H,), jnp.float32), "ln0_b": jnp.zeros((H,), jnp.float32),
        "wq": g(ks[2], (H, H)), "bq": jnp.zeros((H,), jnp.float32),
        "wk": g(ks[3], (H, H)), "bk": jnp.zeros((H,), jnp.float32),
        "wv": g(ks[4], (H, H)), "bv": jnp.zeros((H,), jnp.float32),
        "wo": g(ks[5], (H, H)), "bo": jnp.zeros((H,), jnp.float32),
        "ln1_g": jnp.ones((H,), jnp.float32), "ln1_b": jnp.zeros((H,), jnp.float32),
        "w1": g(ks[6], (H, ffn)), "b1": jnp.zeros((ffn,), jnp.float32),
        "w2": g(ks[7], (ffn, H)), "b2": jnp.zeros((H,), jnp.float32),
        "ln2_g": jnp.ones((H,), jnp.float32), "ln2_b": jnp.zeros((H,), jnp.float32),
        # task head (as in TaskPlannerModel.__init__)
        "start_w": g(ks[8], (H, H)), "start_b": jnp.zeros((H,), jnp.float32),
        "end_w": g(ks[9], (H, H)), "end_b": jnp.zeros((H,), jnp.float32),
        "biaffine_w": g(ks[10], (n_out, H + 1, H + 1)),
    }


def prepare_params(p):
    """One-time weight packing + algebraic folding (hoisted out of forward)."""
    H = p["emb"].shape[1]
    F = p["w1"].shape[1]
    Ws, bs = p["start_w"], p["start_b"]
    We, be = p["end_w"], p["end_b"]
    bw = p["biaffine_w"]                       # (2, H+1, H+1)
    Whh = bw[:, :H, :H]                        # (2, H, H)
    wcol = bw[:, :H, H]                        # (2, H)  -- bias_y column
    wrow = bw[:, H, :H]                        # (2, H)  -- bias_x row
    w00 = bw[:, H, H]                          # (2,)

    # logits[b,o,x,y] = h_x @ A_o @ h_y^T + h_x.c_o + h_y.r_o + k_o
    A = jnp.einsum("mi,oij,nj->omn", Ws, Whh, We)                               # (2,H,H)
    c = jnp.einsum("mi,oij,j->om", Ws, Whh, be) + jnp.einsum("mi,oi->om", Ws, wcol)
    r = jnp.einsum("i,oij,nj->on", bs, Whh, We) + jnp.einsum("oj,nj->on", wrow, We)
    k = (jnp.einsum("i,oij,j->o", bs, Whh, be)
         + jnp.einsum("i,oi->o", bs, wcol)
         + jnp.einsum("oj,j->o", wrow, be) + w00)                               # (2,)

    return {
        "emb": p["emb"], "pos": p["pos"],
        "ln0_g": p["ln0_g"].reshape(1, H), "ln0_b": p["ln0_b"].reshape(1, H),
        "wqkv": jnp.concatenate([p["wq"], p["wk"], p["wv"]], axis=1),           # (H, 3H)
        "bqkv": jnp.concatenate([p["bq"], p["bk"], p["bv"]]).reshape(1, 3 * H),
        "wo": p["wo"], "bo": p["bo"].reshape(1, H),
        "ln1_g": p["ln1_g"].reshape(1, H), "ln1_b": p["ln1_b"].reshape(1, H),
        "w1": p["w1"], "b1": p["b1"].reshape(1, F),
        "w2": p["w2"], "b2": p["b2"].reshape(1, H),
        "ln2_g": p["ln2_g"].reshape(1, H), "ln2_b": p["ln2_b"].reshape(1, H),
        "acat": jnp.concatenate([A[0], A[1]], axis=1),                          # (H, 2H)
        "ccat": c.T,                                                            # (H, 2)
        "k2": k.reshape(1, 2),
        "r2": r,                                                                # (2, H)
    }


def forward(pp, input_ids, mask, labels):
    B, S = input_ids.shape

    # embedding gather + positional add stay in plain JAX glue (data-dependent gather)
    h0 = jnp.take(pp["emb"], input_ids, axis=0) + pp["pos"][:S][None, :, :]
    # additive key mask, precomputed (float32; would need a dtype-aware constant for bf16)
    maskadd = jnp.where(mask > 0, 0.0, -1e9).astype(jnp.float32).reshape(B, 1, S)
    # float label selector for the arithmetic select in the CE epilogue
    ysel = labels.astype(jnp.float32)

    logits2, loss = pl.pallas_call(
        _fused_forward_kernel,
        out_shape=(jax.ShapeDtypeStruct((B, 2 * S, S), jnp.float32),
                   jax.ShapeDtypeStruct((1, 1), jnp.float32)),
        out_specs=(pl.BlockSpec(memory_space=pltpu.MemorySpace.VMEM),
                   pl.BlockSpec(memory_space=pltpu.MemorySpace.SMEM)),
    )(
        h0, maskadd, ysel,
        pp["ln0_g"], pp["ln0_b"],
        pp["wqkv"], pp["bqkv"], pp["wo"], pp["bo"],
        pp["ln1_g"], pp["ln1_b"],
        pp["w1"], pp["b1"], pp["w2"], pp["b2"],
        pp["ln2_g"], pp["ln2_b"],
        pp["acat"], pp["ccat"], pp["k2"], pp["r2"],
    )
    # (B, 2S, S) -> (B, 2, S, S) is a free row-major reshape outside the kernel
    return loss[0, 0], logits2.reshape(B, 2, S, S)


# ----------------------------------------------------------------------------
# Pure-JAX reference (for correctness check)
# ----------------------------------------------------------------------------
def forward_ref(params, input_ids, mask, labels):
    def ln(x, g, b, eps=1e-5):
        mu = jnp.mean(x, -1, keepdims=True)
        var = jnp.mean((x - mu) ** 2, -1, keepdims=True)
        return (x - mu) * jax.lax.rsqrt(var + eps) * g + b

    B, S = input_ids.shape
    h = jnp.take(params["emb"], input_ids, axis=0) + params["pos"][:S][None]
    h = ln(h, params["ln0_g"], params["ln0_b"])
    q = h @ params["wq"] + params["bq"]
    k = h @ params["wk"] + params["bk"]
    v = h @ params["wv"] + params["bv"]
    s = jnp.einsum("bqd,bkd->bqk", q, k) / math.sqrt(q.shape[-1])
    s = s + jnp.where(mask[:, None, :] > 0, 0.0, -1e9)
    a = jax.nn.softmax(s, -1) @ v
    a = a @ params["wo"] + params["bo"]
    h = ln(a + h, params["ln1_g"], params["ln1_b"])
    f = jax.nn.gelu(h @ params["w1"] + params["b1"], approximate=True) @ params["w2"] + params["b2"]
    h = ln(f + h, params["ln2_g"], params["ln2_b"])
    start = h @ params["start_w"] + params["start_b"]
    end = h @ params["end_w"] + params["end_b"]
    ones = jnp.ones((*start.shape[:-1], 1), jnp.float32)
    sb = jnp.concatenate([start, ones], -1)
    eb = jnp.concatenate([end, ones], -1)
    logits = jnp.einsum("bxi,oij,byj->boxy", sb, params["biaffine_w"], eb)
    _l = jnp.transpose(logits, (0, 2, 3, 1)).reshape(-1, 2)
    y = labels.reshape(-1)
    lse = jax.nn.logsumexp(_l, -1)
    loss = jnp.mean(lse - jnp.take_along_axis(_l, y[:, None], 1)[:, 0])
    return loss, logits


# ----------------------------------------------------------------------------
if __name__ == "__main__":
    B, S, H, VOCAB = 2, 8, 32, 64
    key = jax.random.PRNGKey(0)
    kp, ki, km, kl = jax.random.split(key, 4)

    params = init_params(kp, vocab=VOCAB, hidden=H, max_pos=16)
    prepared = prepare_params(params)                      # one-time weight packing
    input_ids = jax.random.randint(ki, (B, S), 0, VOCAB, dtype=jnp.int32)
    mask = jnp.ones((B, S), jnp.int32).at[1, 6:].set(0)    # padded tail
    labels = jax.random.randint(kl, (B, S, S), 0, 2, dtype=jnp.int32)

    fwd = jax.jit(forward)
    loss, logits = fwd(prepared, input_ids, mask, labels)
    jax.block_until_ready((loss, logits))

    loss_ref, logits_ref = forward_ref(params, input_ids, mask, labels)
    assert logits.shape == (B, 2, S, S)
    assert jnp.isfinite(loss)
    assert jnp.allclose(logits, logits_ref, rtol=5e-2, atol=5e-2)
    assert jnp.allclose(loss, loss_ref, rtol=5e-2, atol=5e-2)

    print("KERNEL_OK")
</pallas_src>

<mosaic_0001>
module attributes {stable_mosaic.version = 11 : i64} {
  func.func @_fused_forward_kernel(%arg0: memref<2x8x32xf32, #tpu.memory_space<vmem>>, %arg1: memref<2x1x8xf32, #tpu.memory_space<vmem>>, %arg2: memref<2x8x8xf32, #tpu.memory_space<vmem>>, %arg3: memref<1x32xf32, #tpu.memory_space<vmem>>, %arg4: memref<1x32xf32, #tpu.memory_space<vmem>>, %arg5: memref<32x96xf32, #tpu.memory_space<vmem>>, %arg6: memref<1x96xf32, #tpu.memory_space<vmem>>, %arg7: memref<32x32xf32, #tpu.memory_space<vmem>>, %arg8: memref<1x32xf32, #tpu.memory_space<vmem>>, %arg9: memref<1x32xf32, #tpu.memory_space<vmem>>, %arg10: memref<1x32xf32, #tpu.memory_space<vmem>>, %arg11: memref<32x128xf32, #tpu.memory_space<vmem>>, %arg12: memref<1x128xf32, #tpu.memory_space<vmem>>, %arg13: memref<128x32xf32, #tpu.memory_space<vmem>>, %arg14: memref<1x32xf32, #tpu.memory_space<vmem>>, %arg15: memref<1x32xf32, #tpu.memory_space<vmem>>, %arg16: memref<1x32xf32, #tpu.memory_space<vmem>>, %arg17: memref<32x64xf32, #tpu.memory_space<vmem>>, %arg18: memref<32x2xf32, #tpu.memory_space<vmem>>, %arg19: memref<1x2xf32, #tpu.memory_space<vmem>>, %arg20: memref<2x32xf32, #tpu.memory_space<vmem>>, %arg21: memref<2x16x8xf32, #tpu.memory_space<vmem>>, %arg22: memref<1x1xf32, #tpu.memory_space<smem>>) attributes {dimension_semantics = [], scalar_prefetch = 0 : i64, scratch_operands = 0 : i64, tpu.core_type = #tpu.core_type<tc>} {
    %c0 = arith.constant 0 : index
    %c0_0 = arith.constant 0 : index
    %c0_1 = arith.constant 0 : index
    %0 = vector.load %arg0[%c0, %c0_0, %c0_1] : memref<2x8x32xf32, #tpu.memory_space<vmem>>, vector<2x8x32xf32>
    %1 = vector.shape_cast %0 : vector<2x8x32xf32> to vector<16x32xf32>
    %c0_2 = arith.constant 0 : index
    %c0_3 = arith.constant 0 : index
    %2 = vector.load %arg3[%c0_2, %c0_3] : memref<1x32xf32, #tpu.memory_space<vmem>>, vector<1x32xf32>
    %c0_4 = arith.constant 0 : index
    %c0_5 = arith.constant 0 : index
    %3 = vector.load %arg4[%c0_4, %c0_5] : memref<1x32xf32, #tpu.memory_space<vmem>>, vector<1x32xf32>
    %cst = arith.constant dense<0.000000e+00> : vector<16xf32>
    %4 = vector.multi_reduction <add>, %1, %cst [1] : vector<16x32xf32> to vector<16xf32>
    %5 = vector.shape_cast %4 : vector<16xf32> to vector<16x1xf32>
    %cst_6 = arith.constant 3.200000e+01 : f32
    %6 = vector.broadcast %cst_6 : f32 to vector<16x1xf32>
    %7 = arith.divf %5, %6 : vector<16x1xf32>
    %8 = vector.broadcast %7 : vector<16x1xf32> to vector<16x32xf32>
    %9 = arith.subf %1, %8 : vector<16x32xf32>
    %10 = arith.mulf %9, %9 : vector<16x32xf32>
    %cst_7 = arith.constant dense<0.000000e+00> : vector<16xf32>
    %11 = vector.multi_reduction <add>, %10, %cst_7 [1] : vector<16x32xf32> to vector<16xf32>
    %12 = vector.shape_cast %11 : vector<16xf32> to vector<16x1xf32>
    %cst_8 = arith.constant 3.200000e+01 : f32
    %13 = vector.broadcast %cst_8 : f32 to vector<16x1xf32>
    %14 = arith.divf %12, %13 : vector<16x1xf32>
    %15 = vector.broadcast %7 : vector<16x1xf32> to vector<16x32xf32>
    %16 = arith.subf %1, %15 : vector<16x32xf32>
    %cst_9 = arith.constant 9.99999974E-6 : f32
    %17 = vector.broadcast %cst_9 : f32 to vector<16x1xf32>
    %18 = arith.addf %14, %17 : vector<16x1xf32>
    %19 = math.rsqrt %18 : vector<16x1xf32>
    %20 = vector.broadcast %19 : vector<16x1xf32> to vector<16x32xf32>
    %21 = arith.mulf %16, %20 : vector<16x32xf32>
    %22 = vector.broadcast %2 : vector<1x32xf32> to vector<16x32xf32>
    %23 = arith.mulf %21, %22 : vector<16x32xf32>
    %24 = vector.broadcast %3 : vector<1x32xf32> to vector<16x32xf32>
    %25 = arith.addf %23, %24 : vector<16x32xf32>
    %c0_10 = arith.constant 0 : index
    %c0_11 = arith.constant 0 : index
    %26 = vector.load %arg5[%c0_10, %c0_11] : memref<32x96xf32, #tpu.memory_space<vmem>>, vector<32x96xf32>
    %cst_12 = arith.constant dense<0.000000e+00> : vector<16x96xf32>
    %27 = tpu.matmul %25, %26, %cst_12 {dimension_numbers = #tpu.dot_dimension_numbers<[1], [0], [0], [1], [0, 0, 1, 1], [], []>} : vector<16x32xf32>, vector<32x96xf32>, vector<16x96xf32> -> vector<16x96xf32>
    %c0_13 = arith.constant 0 : index
    %c0_14 = arith.constant 0 : index
    %28 = vector.load %arg6[%c0_13, %c0_14] : memref<1x96xf32, #tpu.memory_space<vmem>>, vector<1x96xf32>
    %29 = vector.broadcast %28 : vector<1x96xf32> to vector<16x96xf32>
    %30 = arith.addf %27, %29 : vector<16x96xf32>
    %31 = vector.extract_strided_slice %30 {offsets = [0, 0], sizes = [16, 32], strides = [1, 1]} : vector<16x96xf32> to vector<16x32xf32>
    %32 = vector.shape_cast %31 : vector<16x32xf32> to vector<2x8x32xf32>
    %33 = vector.extract_strided_slice %30 {offsets = [0, 32], sizes = [16, 32], strides = [1, 1]} : vector<16x96xf32> to vector<16x32xf32>
    %34 = vector.shape_cast %33 : vector<16x32xf32> to vector<2x8x32xf32>
    %35 = vector.extract_strided_slice %30 {offsets = [0, 64], sizes = [16, 32], strides = [1, 1]} : vector<16x96xf32> to vector<16x32xf32>
    %36 = vector.shape_cast %35 : vector<16x32xf32> to vector<2x8x32xf32>
    "tpu.trace_start"() <{level = 10 : i32, message = "bqd,bkd->bqk"}> : () -> ()
    %cst_15 = arith.constant dense<0.000000e+00> : vector<2x8x8xf32>
    %37 = tpu.matmul %32, %34, %cst_15 {dimension_numbers = #tpu.dot_dimension_numbers<[2], [2], [1], [1], [0, 0, 0, 1, 1, 1], [0], [0]>} : vector<2x8x32xf32>, vector<2x8x32xf32>, vector<2x8x8xf32> -> vector<2x8x8xf32>
    "tpu.trace_stop"() : () -> ()
    %cst_16 = arith.constant 0.176776692 : f32
    %38 = vector.broadcast %cst_16 : f32 to vector<2x8x8xf32>
    %39 = arith.mulf %37, %38 : vector<2x8x8xf32>
    %c0_17 = arith.constant 0 : index
    %c0_18 = arith.constant 0 : index
    %c0_19 = arith.constant 0 : index
    %40 = vector.load %arg1[%c0_17, %c0_18, %c0_19] : memref<2x1x8xf32, #tpu.memory_space<vmem>>, vector<2x1x8xf32>
    %41 = vector.broadcast %40 : vector<2x1x8xf32> to vector<2x8x8xf32>
    %42 = arith.addf %39, %41 : vector<2x8x8xf32>
    %cst_20 = arith.constant dense<0xFF800000> : vector<2x8xf32>
    %43 = vector.multi_reduction <maximumf>, %42, %cst_20 [2] : vector<2x8x8xf32> to vector<2x8xf32>
    %44 = vector.shape_cast %43 : vector<2x8xf32> to vector<2x8x1xf32>
    %45 = vector.broadcast %44 : vector<2x8x1xf32> to vector<2x8x8xf32>
    %46 = arith.subf %42, %45 : vector<2x8x8xf32>
    %47 = math.exp %46 : vector<2x8x8xf32>
    %cst_21 = arith.constant dense<0.000000e+00> : vector<2x8xf32>
    %48 = vector.multi_reduction <add>, %47, %cst_21 [2] : vector<2x8x8xf32> to vector<2x8xf32>
    %49 = vector.shape_cast %48 : vector<2x8xf32> to vector<2x8x1xf32>
    %50 = tpu.reciprocal %49 {approx = true} : vector<2x8x1xf32> -> vector<2x8x1xf32>
    %51 = vector.broadcast %50 : vector<2x8x1xf32> to vector<2x8x8xf32>
    %52 = arith.mulf %47, %51 : vector<2x8x8xf32>
    "tpu.trace_start"() <{level = 10 : i32, message = "bqk,bkd->bqd"}> : () -> ()
    %cst_22 = arith.constant dense<0.000000e+00> : vector<2x8x32xf32>
    %53 = tpu.matmul %52, %36, %cst_22 {dimension_numbers = #tpu.dot_dimension_numbers<[2], [1], [1], [2], [0, 0, 0, 1, 1, 2], [0], [0]>} : vector<2x8x8xf32>, vector<2x8x32xf32>, vector<2x8x32xf32> -> vector<2x8x32xf32>
    "tpu.trace_stop"() : () -> ()
    %54 = vector.shape_cast %53 : vector<2x8x32xf32> to vector<16x32xf32>
    %c0_23 = arith.constant 0 : index
    %c0_24 = arith.constant 0 : index
    %55 = vector.load %arg7[%c0_23, %c0_24] : memref<32x32xf32, #tpu.memory_space<vmem>>, vector<32x32xf32>
    %cst_25 = arith.constant dense<0.000000e+00> : vector<16x32xf32>
    %56 = tpu.matmul %54, %55, %cst_25 {dimension_numbers = #tpu.dot_dimension_numbers<[1], [0], [0], [1], [0, 0, 1, 1], [], []>} : vector<16x32xf32>, vector<32x32xf32>, vector<16x32xf32> -> vector<16x32xf32>
    %c0_26 = arith.constant 0 : index
    %c0_27 = arith.constant 0 : index
    %57 = vector.load %arg8[%c0_26, %c0_27] : memref<1x32xf32, #tpu.memory_space<vmem>>, vector<1x32xf32>
    %58 = vector.broadcast %57 : vector<1x32xf32> to vector<16x32xf32>
    %59 = arith.addf %56, %58 : vector<16x32xf32>
    %60 = arith.addf %59, %25 : vector<16x32xf32>
    %c0_28 = arith.constant 0 : index
    %c0_29 = arith.constant 0 : index
    %61 = vector.load %arg9[%c0_28, %c0_29] : memref<1x32xf32, #tpu.memory_space<vmem>>, vector<1x32xf32>
    %c0_30 = arith.constant 0 : index
    %c0_31 = arith.constant 0 : index
    %62 = vector.load %arg10[%c0_30, %c0_31] : memref<1x32xf32, #tpu.memory_space<vmem>>, vector<1x32xf32>
    %cst_32 = arith.constant dense<0.000000e+00> : vector<16xf32>
    %63 = vector.multi_reduction <add>, %60, %cst_32 [1] : vector<16x32xf32> to vector<16xf32>
    %64 = vector.shape_cast %63 : vector<16xf32> to vector<16x1xf32>
    %cst_33 = arith.constant 3.200000e+01 : f32
    %65 = vector.broadcast %cst_33 : f32 to vector<16x1xf32>
    %66 = arith.divf %64, %65 : vector<16x1xf32>
    %67 = vector.broadcast %66 : vector<16x1xf32> to vector<16x32xf32>
    %68 = arith.subf %60, %67 : vector<16x32xf32>
    %69 = arith.mulf %68, %68 : vector<16x32xf32>
    %cst_34 = arith.constant dense<0.000000e+00> : vector<16xf32>
    %70 = vector.multi_reduction <add>, %69, %cst_34 [1] : vector<16x32xf32> to vector<16xf32>
    %71 = vector.shape_cast %70 : vector<16xf32> to vector<16x1xf32>
    %cst_35 = arith.constant 3.200000e+01 : f32
    %72 = vector.broadcast %cst_35 : f32 to vector<16x1xf32>
    %73 = arith.divf %71, %72 : vector<16x1xf32>
    %74 = vector.broadcast %66 : vector<16x1xf32> to vector<16x32xf32>
    %75 = arith.subf %60, %74 : vector<16x32xf32>
    %cst_36 = arith.constant 9.99999974E-6 : f32
    %76 = vector.broadcast %cst_36 : f32 to vector<16x1xf32>
    %77 = arith.addf %73, %76 : vector<16x1xf32>
    %78 = math.rsqrt %77 : vector<16x1xf32>
    %79 = vector.broadcast %78 : vector<16x1xf32> to vector<16x32xf32>
    %80 = arith.mulf %75, %79 : vector<16x32xf32>
    %81 = vector.broadcast %61 : vector<1x32xf32> to vector<16x32xf32>
    %82 = arith.mulf %80, %81 : vector<16x32xf32>
    %83 = vector.broadcast %62 : vector<1x32xf32> to vector<16x32xf32>
    %84 = arith.addf %82, %83 : vector<16x32xf32>
    %c0_37 = arith.constant 0 : index
    %c0_38 = arith.constant 0 : index
    %85 = vector.load %arg11[%c0_37, %c0_38] : memref<32x128xf32, #tpu.memory_space<vmem>>, vector<32x128xf32>
    %cst_39 = arith.constant dense<0.000000e+00> : vector<16x128xf32>
    %86 = tpu.matmul %84, %85, %cst_39 {dimension_numbers = #tpu.dot_dimension_numbers<[1], [0], [0], [1], [0, 0, 1, 1], [], []>} : vector<16x32xf32>, vector<32x128xf32>, vector<16x128xf32> -> vector<16x128xf32>
    %c0_40 = arith.constant 0 : index
    %c0_41 = arith.constant 0 : index
    %87 = vector.load %arg12[%c0_40, %c0_41] : memref<1x128xf32, #tpu.memory_space<vmem>>, vector<1x128xf32>
    %88 = vector.broadcast %87 : vector<1x128xf32> to vector<16x128xf32>
    %89 = arith.addf %86, %88 : vector<16x128xf32>
    %90 = arith.mulf %89, %89 : vector<16x128xf32>
    %91 = arith.mulf %89, %90 : vector<16x128xf32>
    %cst_42 = arith.constant 4.471500e-02 : f32
    %92 = vector.broadcast %cst_42 : f32 to vector<16x128xf32>
    %93 = arith.mulf %92, %91 : vector<16x128xf32>
    %94 = arith.addf %89, %93 : vector<16x128xf32>
    %cst_43 = arith.constant 0.797884583 : f32
    %95 = vector.broadcast %cst_43 : f32 to vector<16x128xf32>
    %96 = arith.mulf %95, %94 : vector<16x128xf32>
    %97 = math.tanh %96 : vector<16x128xf32>
    %cst_44 = arith.constant 1.000000e+00 : f32
    %98 = vector.broadcast %cst_44 : f32 to vector<16x128xf32>
    %99 = arith.addf %98, %97 : vector<16x128xf32>
    %cst_45 = arith.constant 5.000000e-01 : f32
    %100 = vector.broadcast %cst_45 : f32 to vector<16x128xf32>
    %101 = arith.mulf %100, %99 : vector<16x128xf32>
    %102 = arith.mulf %89, %101 : vector<16x128xf32>
    %c0_46 = arith.constant 0 : index
    %c0_47 = arith.constant 0 : index
    %103 = vector.load %arg13[%c0_46, %c0_47] : memref<128x32xf32, #tpu.memory_space<vmem>>, vector<128x32xf32>
    %cst_48 = arith.constant dense<0.000000e+00> : vector<16x32xf32>
    %104 = tpu.matmul %102, %103, %cst_48 {dimension_numbers = #tpu.dot_dimension_numbers<[1], [0], [0], [1], [0, 0, 1, 1], [], []>} : vector<16x128xf32>, vector<128x32xf32>, vector<16x32xf32> -> vector<16x32xf32>
    %c0_49 = arith.constant 0 : index
    %c0_50 = arith.constant 0 : index
    %105 = vector.load %arg14[%c0_49, %c0_50] : memref<1x32xf32, #tpu.memory_space<vmem>>, vector<1x32xf32>
    %106 = vector.broadcast %105 : vector<1x32xf32> to vector<16x32xf32>
    %107 = arith.addf %104, %106 : vector<16x32xf32>
    %108 = arith.addf %107, %84 : vector<16x32xf32>
    %c0_51 = arith.constant 0 : index
    %c0_52 = arith.constant 0 : index
    %109 = vector.load %arg15[%c0_51, %c0_52] : memref<1x32xf32, #tpu.memory_space<vmem>>, vector<1x32xf32>
    %c0_53 = arith.constant 0 : index
    %c0_54 = arith.constant 0 : index
    %110 = vector.load %arg16[%c0_53, %c0_54] : memref<1x32xf32, #tpu.memory_space<vmem>>, vector<1x32xf32>
    %cst_55 = arith.constant dense<0.000000e+00> : vector<16xf32>
    %111 = vector.multi_reduction <add>, %108, %cst_55 [1] : vector<16x32xf32> to vector<16xf32>
    %112 = vector.shape_cast %111 : vector<16xf32> to vector<16x1xf32>
    %cst_56 = arith.constant 3.200000e+01 : f32
    %113 = vector.broadcast %cst_56 : f32 to vector<16x1xf32>
    %114 = arith.divf %112, %113 : vector<16x1xf32>
    %115 = vector.broadcast %114 : vector<16x1xf32> to vector<16x32xf32>
    %116 = arith.subf %108, %115 : vector<16x32xf32>
    %117 = arith.mulf %116, %116 : vector<16x32xf32>
    %cst_57 = arith.constant dense<0.000000e+00> : vector<16xf32>
    %118 = vector.multi_reduction <add>, %117, %cst_57 [1] : vector<16x32xf32> to vector<16xf32>
    %119 = vector.shape_cast %118 : vector<16xf32> to vector<16x1xf32>
    %cst_58 = arith.constant 3.200000e+01 : f32
    %120 = vector.broadcast %cst_58 : f32 to vector<16x1xf32>
    %121 = arith.divf %119, %120 : vector<16x1xf32>
    %122 = vector.broadcast %114 : vector<16x1xf32> to vector<16x32xf32>
    %123 = arith.subf %108, %122 : vector<16x32xf32>
    %cst_59 = arith.constant 9.99999974E-6 : f32
    %124 = vector.broadcast %cst_59 : f32 to vector<16x1xf32>
    %125 = arith.addf %121, %124 : vector<16x1xf32>
    %126 = math.rsqrt %125 : vector<16x1xf32>
    %127 = vector.broadcast %126 : vector<16x1xf32> to vector<16x32xf32>
    %128 = arith.mulf %123, %127 : vector<16x32xf32>
    %129 = vector.broadcast %109 : vector<1x32xf32> to vector<16x32xf32>
    %130 = arith.mulf %128, %129 : vector<16x32xf32>
    %131 = vector.broadcast %110 : vector<1x32xf32> to vector<16x32xf32>
    %132 = arith.addf %130, %131 : vector<16x32xf32>
    %133 = vector.shape_cast %132 : vector<16x32xf32> to vector<2x8x32xf32>
    %c0_60 = arith.constant 0 : index
    %c0_61 = arith.constant 0 : index
    %134 = vector.load %arg17[%c0_60, %c0_61] : memref<32x64xf32, #tpu.memory_space<vmem>>, vector<32x64xf32>
    %cst_62 = arith.constant dense<0.000000e+00> : vector<16x64xf32>
    %135 = tpu.matmul %132, %134, %cst_62 {dimension_numbers = #tpu.dot_dimension_numbers<[1], [0], [0], [1], [0, 0, 1, 1], [], []>} : vector<16x32xf32>, vector<32x64xf32>, vector<16x64xf32> -> vector<16x64xf32>
    %c0_63 = arith.constant 0 : index
    %c0_64 = arith.constant 0 : index
    %136 = vector.load %arg18[%c0_63, %c0_64] : memref<32x2xf32, #tpu.memory_space<vmem>>, vector<32x2xf32>
    %cst_65 = arith.constant dense<0.000000e+00> : vector<16x2xf32>
    %137 = tpu.matmul %132, %136, %cst_65 {dimension_numbers = #tpu.dot_dimension_numbers<[1], [0], [0], [1], [0, 0, 1, 1], [], []>} : vector<16x32xf32>, vector<32x2xf32>, vector<16x2xf32> -> vector<16x2xf32>
    %c0_66 = arith.constant 0 : index
    %c0_67 = arith.constant 0 : index
    %138 = vector.load %arg19[%c0_66, %c0_67] : memref<1x2xf32, #tpu.memory_space<vmem>>, vector<1x2xf32>
    %139 = vector.broadcast %138 : vector<1x2xf32> to vector<16x2xf32>
    %140 = arith.addf %137, %139 : vector<16x2xf32>
    %c0_68 = arith.constant 0 : index
    %c0_69 = arith.constant 0 : index
    %141 = vector.load %arg20[%c0_68, %c0_69] : memref<2x32xf32, #tpu.memory_space<vmem>>, vector<2x32xf32>
    %142 = vector.extract_strided_slice %135 {offsets = [0, 0], sizes = [16, 32], strides = [1, 1]} : vector<16x64xf32> to vector<16x32xf32>
    %143 = vector.extract_strided_slice %141 {offsets = [0, 0], sizes = [1, 32], strides = [1, 1]} : vector<2x32xf32> to vector<1x32xf32>
    %144 = vector.broadcast %143 : vector<1x32xf32> to vector<16x32xf32>
    %145 = arith.addf %142, %144 : vector<16x32xf32>
    %146 = vector.shape_cast %145 : vector<16x32xf32> to vector<2x8x32xf32>
    %147 = vector.extract_strided_slice %135 {offsets = [0, 32], sizes = [16, 32], strides = [1, 1]} : vector<16x64xf32> to vector<16x32xf32>
    %148 = vector.extract_strided_slice %141 {offsets = [1, 0], sizes = [1, 32], strides = [1, 1]} : vector<2x32xf32> to vector<1x32xf32>
    %149 = vector.broadcast %148 : vector<1x32xf32> to vector<16x32xf32>
    %150 = arith.addf %147, %149 : vector<16x32xf32>
    %151 = vector.shape_cast %150 : vector<16x32xf32> to vector<2x8x32xf32>
    %152 = tpu.concatenate %146, %151 in 1 : vector<2x8x32xf32>, vector<2x8x32xf32> -> vector<2x16x32xf32>
    "tpu.trace_start"() <{level = 10 : i32, message = "bxj,byj->bxy"}> : () -> ()
    %cst_70 = arith.constant dense<0.000000e+00> : vector<2x16x8xf32>
    %153 = tpu.matmul %152, %133, %cst_70 {dimension_numbers = #tpu.dot_dimension_numbers<[2], [2], [1], [1], [0, 0, 0, 1, 1, 1], [0], [0]>} : vector<2x16x32xf32>, vector<2x8x32xf32>, vector<2x16x8xf32> -> vector<2x16x8xf32>
    "tpu.trace_stop"() : () -> ()
    %154 = vector.extract_strided_slice %140 {offsets = [0, 0], sizes = [16, 1], strides = [1, 1]} : vector<16x2xf32> to vector<16x1xf32>
    %155 = vector.shape_cast %154 : vector<16x1xf32> to vector<2x8x1xf32>
    %156 = vector.extract_strided_slice %140 {offsets = [0, 1], sizes = [16, 1], strides = [1, 1]} : vector<16x2xf32> to vector<16x1xf32>
    %157 = vector.shape_cast %156 : vector<16x1xf32> to vector<2x8x1xf32>
    %158 = tpu.concatenate %155, %157 in 1 : vector<2x8x1xf32>, vector<2x8x1xf32> -> vector<2x16x1xf32>
    %159 = vector.broadcast %158 : vector<2x16x1xf32> to vector<2x16x8xf32>
    %160 = arith.addf %153, %159 : vector<2x16x8xf32>
    %c0_71 = arith.constant 0 : index
    %c0_72 = arith.constant 0 : index
    %c0_73 = arith.constant 0 : index
    %161 = vector.load %arg21[%c0_71, %c0_72, %c0_73] : memref<2x16x8xf32, #tpu.memory_space<vmem>>, vector<2x16x8xf32>
    tpu.vector_store %arg21[%c0_71, %c0_72, %c0_73], %160 {strides = array<i32>} : memref<2x16x8xf32, #tpu.memory_space<vmem>>, vector<2x16x8xf32>,
    %162 = vector.extract_strided_slice %160 {offsets = [0, 0, 0], sizes = [2, 8, 8], strides = [1, 1, 1]} : vector<2x16x8xf32> to vector<2x8x8xf32>
    %163 = vector.extract_strided_slice %160 {offsets = [0, 8, 0], sizes = [2, 8, 8], strides = [1, 1, 1]} : vector<2x16x8xf32> to vector<2x8x8xf32>
    %164 = arith.maximumf %162, %163 : vector<2x8x8xf32>
    %165 = arith.subf %162, %164 : vector<2x8x8xf32>
    %166 = math.exp %165 : vector<2x8x8xf32>
    %167 = arith.subf %163, %164 : vector<2x8x8xf32>
    %168 = math.exp %167 : vector<2x8x8xf32>
    %169 = arith.addf %166, %168 : vector<2x8x8xf32>
    %170 = math.log %169 : vector<2x8x8xf32>
    %171 = arith.addf %164, %170 : vector<2x8x8xf32>
    %c0_74 = arith.constant 0 : index
    %c0_75 = arith.constant 0 : index
    %c0_76 = arith.constant 0 : index
    %172 = vector.load %arg2[%c0_74, %c0_75, %c0_76] : memref<2x8x8xf32, #tpu.memory_space<vmem>>, vector<2x8x8xf32>
    %173 = arith.subf %163, %162 : vector<2x8x8xf32>
    %174 = arith.mulf %172, %173 : vector<2x8x8xf32>
    %175 = arith.addf %162, %174 : vector<2x8x8xf32>
    %176 = arith.subf %171, %175 : vector<2x8x8xf32>
    %177 = vector.shape_cast %176 : vector<2x8x8xf32> to vector<1x2x8x8xf32>
    %cst_77 = arith.constant dense<0.000000e+00> : vector<1xf32>
    %178 = vector.multi_reduction <add>, %177, %cst_77 [1, 2, 3] : vector<1x2x8x8xf32> to vector<1xf32>
    %179 = vector.shape_cast %178 : vector<1xf32> to vector<1x1x1x1xf32>
    %180 = vector.extract %179[0, 0, 0, 0] : f32 from vector<1x1x1x1xf32>
    %cst_78 = arith.constant 7.812500e-03 : f32
    %181 = arith.mulf %180, %cst_78 : f32
    %c0_79 = arith.constant 0 : index
    %c0_80 = arith.constant 0 : index
    %182 = memref.load %arg22[%c0_79, %c0_80] : memref<1x1xf32, #tpu.memory_space<smem>>
    memref.store %181, %arg22[%c0_79, %c0_80] : memref<1x1xf32, #tpu.memory_space<smem>>
    return
  }
}

</mosaic_0001>

<bundles_post_ra>
// kernel: forward.1
= control target key start
LH: loop header
LB: loop body
LE: loop exit
PB: predicated region body
PF: predicated region fallthrough
CT: control target
= control target key end

     0   :  { %s1309_s0 = inlined_call_operand.vmem [shape: f32[2,8,32], index: 0, kind: input, shape index: {}]   ;;  %s1310_s1 = inlined_call_operand.vmem [shape: f32[2,1,8], index: 1, kind: input, shape index: {}]   ;;  %s1311_s2 = inlined_call_operand.vmem [shape: f32[2,8,8], index: 2, kind: input, shape index: {}]   ;;  %s1312_s3 = inlined_call_operand.vmem [shape: f32[1,32], index: 3, kind: input, shape index: {}]   ;;  %s1313_s4 = inlined_call_operand.vmem [shape: f32[1,32], index: 4, kind: input, shape index: {}]   ;;  %s1314_s5 = inlined_call_operand.vmem [shape: f32[32,96], index: 5, kind: input, shape index: {}]   ;;  %s1315_s6 = inlined_call_operand.vmem [shape: f32[1,96], index: 6, kind: input, shape index: {}]   ;;  %s1316_s7 = inlined_call_operand.vmem [shape: f32[32,32], index: 7, kind: input, shape index: {}]   ;;  %s1317_s8 = inlined_call_operand.vmem [shape: f32[1,32], index: 8, kind: input, shape index: {}]   ;;  %s1318_s9 = inlined_call_operand.vmem [shape: f32[1,32], index: 9, kind: input, shape index: {}]   ;;  %s1319_s10 = inlined_call_operand.vmem [shape: f32[1,32], index: 10, kind: input, shape index: {}]   ;;  %s1320_s11 = inlined_call_operand.vmem [shape: f32[32,128], index: 11, kind: input, shape index: {}]   ;;  %s1321_s12 = inlined_call_operand.vmem [shape: f32[1,128], index: 12, kind: input, shape index: {}]   ;;  %s1322_s13 = inlined_call_operand.vmem [shape: f32[128,32], index: 13, kind: input, shape index: {}]   ;;  %s1323_s14 = inlined_call_operand.vmem [shape: f32[1,32], index: 14, kind: input, shape index: {}]   ;;  %s1324_s15 = inlined_call_operand.vmem [shape: f32[1,32], index: 15, kind: input, shape index: {}]   ;;  %s1325_s16 = inlined_call_operand.vmem [shape: f32[1,32], index: 16, kind: input, shape index: {}]   ;;  %s1326_s17 = inlined_call_operand.vmem [shape: f32[32,64], index: 17, kind: input, shape index: {}]   ;;  %s1327_s18 = inlined_call_operand.vmem [shape: f32[32,2], index: 18, kind: input, shape index: {}]   ;;  %s1328_s19 = inlined_call_operand.vmem [shape: f32[1,2], index: 19, kind: input, shape index: {}]   ;;  %s1329_s20 = inlined_call_operand.vmem [shape: f32[2,32], index: 20, kind: input, shape index: {}]   ;;  %s1330_s21 = inlined_call_operand.hbm [shape: f32[2,16,8], index: 21, kind: output, shape index: {0}]   ;;  %s1331_s22 = inlined_call_operand.hbm [shape: f32[1,1], index: 22, kind: output, shape index: {1}]  }
   0x1   :  { %1336 = sst [smem:[#allocation8_spill]] %s1309_s0 }
   0x2   :  { %1337 = sst [smem:[#allocation9_spill]] %s1310_s1 }
   0x3   :  { %1338 = sst [smem:[#allocation10_spill]] %s1311_s2 }
   0x4   :  { %1339 = sst [smem:[#allocation11_spill]] %s1312_s3 }
   0x5   :  { %1340 = sst [smem:[#allocation12_spill]] %s1313_s4 }
   0x6   :  { %1341 = sst [smem:[#allocation13_spill]] %s1314_s5 }
   0x7   :  { %1342 = sst [smem:[#allocation14_spill]] %s1315_s6 }
   0x8   :  { %28 = vsyncpa [#allocation3], 0  ;;  %s1343_s29 = sld [smem:[#allocation8_spill]]  ;;  %vm76_vm0 = vcmask 261120  }
   0xe   :  { %v72_v0 = vld [vmem:[%s1343_s29] sm:$0xff]  ;;  %v73_v2 = vld [vmem:[%s1343_s29 + $0x8] sm:$0xff] }
   0xf   :  { %v77_v1 = vsel %vm76_vm0, %v72_v0, 0.0 }
  0x10   :  { %78 = vadd.xlane.f32.xlu0 %v77_v1 }
  0x11   :  { %29 = vsyncpa [#allocation4], 0  ;;  %v80_v3 = vsel %vm76_vm0, %v73_v2, 0.0  ;;  %v938_v4 = vmov 32.0   ;;  %s1344_s1 = sld [smem:[#allocation13_spill]]  ;;  %s939_s5 = smov 96  }
  0x12   :  { %860 = vrcp.f32 %v938_v4  ;;  %s1345_s28 = sld [smem:[#allocation11_spill]]  ;;  %vm241_vm8 = vcmask 64512   ;;  %s940_s27 = smov 64  }
  0x13   :  { %s1346_s4 = sld [smem:[#allocation12_spill]]  ;;  %s944_s30 = smov [#allocation2]  }
  0x14   :  { %s1348_s25 = sld [smem:[#allocation9_spill]]  ;;  %s783_s23 = sshll.u32 %s1330_s21, 4  ;;  %s784_s23 = int_to_ptr.hbm [resolvable:$true] %s783_s23 }
  0x15   :  { %s946_s24 = smov 8   ;;  %s947_s21 = smov [#allocation5]  }
  0x17   :  { %v141_v21 = vld [vmem:[%s1344_s1 + $0x18] sm:$0xff]  ;;  %v140_v22 = vld [vmem:[%s1344_s1 + $0x10] sm:$0xff]  ;;  %v139_v23 = vld [vmem:[%s1344_s1 + $0x8] sm:$0xff] }
  0x18   :  { %81 = vadd.xlane.f32.xlu0 %v80_v3  ;;  %v861_v5 = vpop.eup %860  ;;  %164 = vmatpush.msra.mxu0 %v141_v21  ;;  %v138_v24 = vld [vmem:[%s1344_s1] sm:$0xff]  ;;  %s1347_s1 = sld [smem:[#allocation14_spill]]  ;;  %v317_v21 = vld [vmem:[%s1316_s7 + $0x8] sm:$0xff] }
  0x19   :  { %v84_v6 = vmul.f32 32.0, %v861_v5  ;;  %vm88_vm1 = vweird.f32 %v861_v5  ;;  %v847_v39 = vld [vmem:[%s1345_s28] ss:$0 sm:$0xff] }
  0x1a   :  { %165 = vmatpush.msra.mxu0 %v140_v22  ;;  %v848_v43 = vld [vmem:[%s1346_s4] ss:$0 sm:$0xff]  ;;  %v851_v1 = vld [vmem:[%s1348_s25 + $0x1] ss:$0 sm:$0xff] }
  0x1b   :  { %v85_v7 = vsub.f32 1.0, %v84_v6  ;;  %v850_v60 = vld [vmem:[%s1348_s25] ss:$0 sm:$0xff] }
  0x1c   :  { %166 = vmatpush.msra.mxu0 %v139_v23 }
  0x1d   :  { %v86_v8 = vmul.f32 %v861_v5, %v85_v7 }
  0x1e   :  { %167 = vmatpush.msra.mxu0 %v138_v24  ;;  %v849_v53 = vld [vmem:[%s1347_s1] ss:$0 sm:$0xff]  ;;  %s945_s1 = smov 128  }
  0x1f   :  { %v87_v9 = vadd.f32 %v861_v5, %v86_v8 }
  0x21   :  { %v1071_v10 = vsel %vm88_vm1, %v861_v5, %v87_v9 }
  0x83   :  { %v79_v11 = vpop.xlane.xlu0 %78 }
  0x84   :  { %v90_v12 = vmul.f32 %v1071_v10, %v79_v11 }
  0x86   :  { %v92_v13 = vsub.f32 %v72_v0, %v90_v12 }
  0x88   :  { %v94_v14 = vmul.f32 %v92_v13, %v92_v13 }
  0x8a   :  { %v96_v15 = vsel %vm76_vm0, %v94_v14, 0.0 }
  0x8b   :  { %97 = vadd.xlane.f32.xlu1 %v96_v15  ;;  %v82_v16 = vpop.xlane.xlu0 %81 }
  0x8c   :  { %v91_v17 = vmul.f32 %v1071_v10, %v82_v16 }
  0x8e   :  { %v93_v18 = vsub.f32 %v73_v2, %v91_v17 }
  0x90   :  { %v95_v19 = vmul.f32 %v93_v18, %v93_v18 }
  0x92   :  { %v99_v20 = vsel %vm76_vm0, %v95_v19, 0.0  ;;  %v319_v19 = vld [vmem:[%s1316_s7 + $0x18] sm:$0xff] }
  0x93   :  { %100 = vadd.xlane.f32.xlu1 %v99_v20  ;;  %v318_v20 = vld [vmem:[%s1316_s7 + $0x10] sm:$0xff] }
  0xfe   :  { %v98_v25 = vpop.xlane.xlu1 %97 }
  0xff   :  { %v102_v26 = vmul.f32 %v98_v25, %v1071_v10 }
 0x101   :  { %v104_v27 = vadd.f32 1e-05, %v102_v26 }
 0x103   :  { %862 = vrsqrt.f32 %v104_v27  ;;  %vm112_vm3 = vweird.f32 %v104_v27 }
 0x106   :  { %v101_v28 = vpop.xlane.xlu1 %100 }
 0x107   :  { %v103_v29 = vmul.f32 %v101_v28, %v1071_v10  ;;  %v316_v28 = vld [vmem:[%s1316_s7] sm:$0xff] }
 0x109   :  { %v863_v30 = vpop.eup %862  ;;  %v105_v31 = vadd.f32 1e-05, %v103_v29 }
 0x10a   :  { %v107_v32 = vmul.f32 %v863_v30, %v104_v27  ;;  %vm113_vm2 = vweird.f32 %v863_v30 }
 0x10b   :  { %864 = vrsqrt.f32 %v105_v31  ;;  %vm114_vm4 = vmor %vm112_vm3, %vm113_vm2  ;;  %vm122_vm6 = vweird.f32 %v105_v31 }
 0x10c   :  { %v108_v33 = vmul.f32 %v863_v30, %v107_v32 }
 0x10e   :  { %v109_v34 = vmul.f32 0.5, %v108_v33 }
 0x110   :  { %v110_v35 = vsub.f32 1.5, %v109_v34 }
 0x111   :  { %v865_v36 = vpop.eup %864 }
 0x112   :  { %v111_v37 = vmul.f32 %v863_v30, %v110_v35  ;;  %v117_v38 = vmul.f32 %v865_v36, %v105_v31  ;;  %vm123_vm5 = vweird.f32 %v865_v36  ;;  %v852_v31 = vld [vmem:[%s1317_s8] ss:$0 sm:$0xff] }
 0x113   :  { %vm124_vm7 = vmor %vm122_vm6, %vm123_vm5 }
 0x114   :  { %v115_v40 = vsel %vm114_vm4, %v863_v30, %v111_v37  ;;  %v118_v41 = vmul.f32 %v865_v36, %v117_v38 }
 0x115   :  { %v126_v42 = vmul.f32 %v115_v40, %v92_v13 }
 0x116   :  { %v119_v44 = vmul.f32 0.5, %v118_v41 }
 0x117   :  { %v131_v45 = vmul.f32 %v847_v39, %v126_v42 }
 0x118   :  { %v120_v46 = vsub.f32 1.5, %v119_v44 }
 0x119   :  { %v1097_v47 = vadd.f32 %v848_v43, %v131_v45 }
 0x11a   :  { %v121_v48 = vmul.f32 %v865_v36, %v120_v46 }
 0x11b   :  { %810 = vmatmul.msk.f32.vlgmr.msra.gmra.mxu0 %vm76_vm0, %v1097_v47 }
 0x11c   :  { %v125_v49 = vsel %vm124_vm7, %v865_v36, %v121_v48 }
 0x11d   :  { %v127_v50 = vmul.f32 %v125_v49, %v93_v18 }
 0x11f   :  { %v132_v51 = vmul.f32 %v847_v39, %v127_v50  ;;  %v414_v50 = vld [vmem:[%s1320_s11 + $0x18] sm:$0xff] }
 0x121   :  { %v1101_v52 = vadd.f32 %v848_v43, %v132_v51  ;;  %v413_v51 = vld [vmem:[%s1320_s11 + $0x10] sm:$0xff] }
 0x123   :  { %811 = vmatmul.msk.f32.gmra.mxu0 %vm76_vm0, %v1101_v52 }
 0x198   :  { %v169_v54 = vpop.f32.mrf.mxu0 }
 0x199   :  { %v170_v55 = vadd.f32 %v849_v53, %v169_v54 }
 0x19b   :  { %176 = vrot.lane.b32.xlu2 %v170_v55, %s939_s5 }
 0x1a0   :  { %v172_v56 = vpop.f32.mrf.mxu0 }
 0x1a1   :  { %v173_v57 = vadd.f32 %v849_v53, %v172_v56  ;;  %v411_v53 = vld [vmem:[%s1320_s11] sm:$0xff] }
 0x1a3   :  { %203 = vrot.lane.b32.xlu2 %v173_v57, %s939_s5 }
 0x1f5   :  { %v177_v58 = vpop.permute.xlu2 %176 }
 0x1f6   :  { %812 = vmatpush.xpose.msk.msra.mxu1 %vm76_vm0, %v177_v58 }
 0x1f9   :  { %813 = vmatmul.msk.f32.vlgmr.msra.gmra.mxu1 %vm76_vm0, %v170_v55 }
 0x1fa   :  { %342 = vmatpush.msrb.mxu1 %v319_v19 }
 0x1fc   :  { %343 = vmatpush.msrb.mxu1 %v318_v20 }
 0x1fd   :  { %v204_v59 = vpop.permute.xlu2 %203 }
 0x1fe   :  { %814 = vmatpush.xpose.msk.msra.mxu2 %vm76_vm0, %v204_v59  ;;  %344 = vmatpush.msrb.mxu1 %v317_v21 }
 0x200   :  { %345 = vmatpush.msrb.mxu1 %v316_v28  ;;  %v472_v28 = vld [vmem:[%s1322_s13 + $0x30] sm:$0xff] }
 0x201   :  { %815 = vmatmul.msk.f32.vlgmr.msra.gmra.mxu2 %vm76_vm0, %v173_v57 }
 0x202   :  { %437 = vmatpush.msrb.mxu2 %v414_v50 }
 0x204   :  { %438 = vmatpush.msrb.mxu2 %v413_v51 }
 0x276   :  { %v199_v61 = vpop.f32.mrf.mxu1 }
 0x277   :  { %v229_v62 = vmul.f32 0.17677669, %v199_v61 }
 0x279   :  { %v239_v63 = vadd.f32 %v850_v60, %v229_v62 }
 0x27b   :  { %v242_v0 = vsel %vm241_vm8, %v239_v63, -inf }
 0x27c   :  { %243 = vmax.xlane.f32.xlu0 %v242_v0 }
 0x284   :  { %v226_v2 = vpop.f32.mrf.mxu2 }
 0x285   :  { %v230_v3 = vmul.f32 0.17677669, %v226_v2  ;;  %v480_v2 = vld [vmem:[%s1322_s13 + $0x70] sm:$0xff] }
 0x287   :  { %v240_v4 = vadd.f32 %v851_v1, %v230_v3  ;;  %v481_v1 = vld [vmem:[%s1322_s13 + $0x78] sm:$0xff] }
 0x288   :  { %486 = vmatpush.msrb.mxu0 %v481_v1 }
 0x289   :  { %v245_v5 = vsel %vm241_vm8, %v240_v4, -inf }
 0x28a   :  { %246 = vmax.xlane.f32.xlu1 %v245_v5  ;;  %v479_v5 = vld [vmem:[%s1322_s13 + $0x68] sm:$0xff]  ;;  %487 = vmatpush.msrb.mxu0 %v480_v2 }
 0x28c   :  { %488 = vmatpush.msrb.mxu0 %v479_v5 }
 0x2a3   :  { %264 = vrot.lane.b32.xlu1 %v170_v55, %s940_s27 }
 0x2ef   :  { %v244_v6 = vpop.xlane.xlu0 %243 }
 0x2f0   :  { %v248_v7 = vsub.f32 %v239_v63, %v244_v6  ;;  %v853_v63 = vld [vmem:[%s1318_s9] ss:$0 sm:$0xff]  ;;  %s795_s9 = sshll.u32 %s1331_s22, 4  ;;  %s796_s9 = int_to_ptr.hbm [resolvable:$true] %s795_s9 }
 0x2f2   :  { %v250_v8 = vmul.f32 1.442695, %v248_v7 }
 0x2f4   :  { %866 = vpow2.f32 %v250_v8 }
 0x2fa   :  { %v867_v9 = vpop.eup %866 }
 0x2fb   :  { %v254_v11 = vsel %vm241_vm8, %v867_v9, 0.0 }
 0x2fc   :  { %255 = vadd.xlane.f32.xlu2 %v254_v11 }
 0x2fd   :  { %v247_v12 = vpop.xlane.xlu1 %246 }
 0x2fe   :  { %v249_v13 = vsub.f32 %v240_v4, %v247_v12  ;;  %v854_v4 = vld [vmem:[%s1319_s10] ss:$0 sm:$0xff] }
 0x300   :  { %v252_v14 = vmul.f32 1.442695, %v249_v13 }
 0x302   :  { %868 = vpow2.f32 %v252_v14 }
 0x308   :  { %v869_v15 = vpop.eup %868 }
 0x309   :  { %v257_v16 = vsel %vm241_vm8, %v869_v15, 0.0 }
 0x30a   :  { %258 = vadd.xlane.f32.xlu0 %v257_v16 }
 0x315   :  { %v265_v17 = vpop.permute.xlu1 %264 }
 0x316   :  { %285 = vmatpush.msra.mxu3 %v265_v17 }
 0x31e   :  { %290 = vrot.lane.b32.xlu0 %v173_v57, %s940_s27 }
 0x36f   :  { %v256_v18 = vpop.xlane.xlu2 %255 }
 0x370   :  { %870 = vrcp.f32 %v256_v18 }
 0x376   :  { %v871_v22 = vpop.eup %870 }
 0x377   :  { %v262_v23 = vmul.f32 %v871_v22, %v867_v9  ;;  %v478_v22 = vld [vmem:[%s1322_s13 + $0x60] sm:$0xff] }
 0x378   :  { %489 = vmatpush.msrb.mxu0 %v478_v22 }
 0x379   :  { %816 = vmatmul.msk.f32.vlgmr.msra.gmra.mxu3 %vm241_vm8, %v262_v23  ;;  %v477_v23 = vld [vmem:[%s1322_s13 + $0x58] sm:$0xff] }
 0x37a   :  { %490 = vmatpush.msrb.mxu0 %v477_v23 }
 0x37d   :  { %v259_v24 = vpop.xlane.xlu0 %258 }
 0x37e   :  { %872 = vrcp.f32 %v259_v24  ;;  %v476_v24 = vld [vmem:[%s1322_s13 + $0x50] sm:$0xff] }
 0x37f   :  { %491 = vmatpush.msrb.mxu0 %v476_v24 }
 0x384   :  { %v873_v25 = vpop.eup %872 }
 0x385   :  { %v263_v27 = vmul.f32 %v873_v25, %v869_v15  ;;  %v475_v25 = vld [vmem:[%s1322_s13 + $0x48] sm:$0xff] }
 0x386   :  { %492 = vmatpush.msrb.mxu0 %v475_v25 }
 0x390   :  { %v291_v26 = vpop.permute.xlu0 %290 }
 0x391   :  { %311 = vmatpush.msrb.mxu3 %v291_v26  ;;  %v474_v26 = vld [vmem:[%s1322_s13 + $0x40] sm:$0xff] }
 0x392   :  { %817 = vmatmul.msk.f32.vlgmr.msrb.gmra.mxu3 %vm241_vm8, %v263_v27  ;;  %493 = vmatpush.msrb.mxu0 %v474_v26  ;;  %v473_v27 = vld [vmem:[%s1322_s13 + $0x38] sm:$0xff] }
 0x394   :  { %494 = vmatpush.msrb.mxu0 %v473_v27  ;;  %v631_v27 = vld [vmem:[%s1329_s20] sm:$0x3]  ;;  %s943_s20 = smov 127  }
 0x396   :  { %495 = vmatpush.msrb.mxu0 %v472_v28  ;;  %v635_v28 = vperm.slane %v631_v27, 1 }
 0x3fc   :  { %v287_v29 = vpop.f32.mrf.mxu3 }
 0x3fd   :  { %818 = vmatmul.msk.f32.vlgmr.msrb.gmra.mxu1 %vm76_vm0, %v287_v29  ;;  %v471_v29 = vld [vmem:[%s1322_s13 + $0x28] sm:$0xff] }
 0x3fe   :  { %496 = vmatpush.msrb.mxu0 %v471_v29 }
 0x415   :  { %v313_v30 = vpop.f32.mrf.mxu3 }
 0x416   :  { %819 = vmatmul.msk.f32.gmra.mxu1 %vm76_vm0, %v313_v30  ;;  %v470_v30 = vld [vmem:[%s1322_s13 + $0x20] sm:$0xff] }
 0x417   :  { %497 = vmatpush.msrb.mxu0 %v470_v30 }
 0x47a   :  { %v347_v32 = vpop.f32.mrf.mxu1 }
 0x47b   :  { %v348_v33 = vadd.f32 %v852_v31, %v347_v32  ;;  %v468_v32 = vld [vmem:[%s1322_s13 + $0x10] sm:$0xff] }
 0x47d   :  { %v353_v34 = vadd.f32 %v348_v33, %v1097_v47  ;;  %v467_v33 = vld [vmem:[%s1322_s13 + $0x8] sm:$0xff] }
 0x47f   :  { %v357_v35 = vsel %vm76_vm0, %v353_v34, 0.0 }
 0x480   :  { %358 = vadd.xlane.f32.xlu1 %v357_v35  ;;  %v855_v35 = vld [vmem:[%s1321_s12] ss:$0 sm:$0xff] }
 0x493   :  { %v350_v36 = vpop.f32.mrf.mxu1 }
 0x494   :  { %v351_v37 = vadd.f32 %v852_v31, %v350_v36  ;;  %v469_v31 = vld [vmem:[%s1322_s13 + $0x18] sm:$0xff] }
 0x495   :  { %498 = vmatpush.msrb.mxu0 %v469_v31 }
 0x496   :  { %v354_v38 = vadd.f32 %v351_v37, %v1101_v52  ;;  %v412_v52 = vld [vmem:[%s1320_s11 + $0x8] sm:$0xff]  ;;  %s781_s11 = sshll.u32 %s944_s30, 4  ;;  %s782_s11 = int_to_ptr.vmem [resolvable:$true] %s781_s11 }
 0x497   :  { %439 = vmatpush.msrb.mxu2 %v412_v52  ;;  %499 = vmatpush.msrb.mxu0 %v468_v32 }
 0x498   :  { %v360_v39 = vsel %vm76_vm0, %v354_v38, 0.0 }
 0x499   :  { %361 = vadd.xlane.f32.xlu0 %v360_v39  ;;  %440 = vmatpush.msrb.mxu2 %v411_v53 }
 0x49a   :  { %500 = vmatpush.msrb.mxu0 %v467_v33  ;;  %v857_v33 = vld [vmem:[%s1324_s15] ss:$0 sm:$0xff] }
 0x4f3   :  { %v359_v40 = vpop.xlane.xlu1 %358 }
 0x4f4   :  { %v363_v41 = vmul.f32 %v359_v40, %v1071_v10 }
 0x4f6   :  { %v365_v42 = vsub.f32 %v353_v34, %v363_v41  ;;  %v466_v34 = vld [vmem:[%s1322_s13] sm:$0xff]  ;;  %s1349_s13 = sld [smem:[#allocation10_spill]] }
 0x4f7   :  { %501 = vmatpush.msrb.mxu0 %v466_v34 }
 0x4f8   :  { %v367_v43 = vmul.f32 %v365_v42, %v365_v42 }
 0x4fa   :  { %v369_v44 = vsel %vm76_vm0, %v367_v43, 0.0 }
 0x4fb   :  { %370 = vadd.xlane.f32.xlu2 %v369_v44 }
 0x50c   :  { %v362_v45 = vpop.xlane.xlu0 %361 }
 0x50d   :  { %v364_v46 = vmul.f32 %v362_v45, %v1071_v10 }
 0x50f   :  { %v366_v47 = vsub.f32 %v354_v38, %v364_v46 }
 0x511   :  { %v368_v48 = vmul.f32 %v366_v47, %v366_v47 }
 0x513   :  { %v372_v49 = vsel %vm76_vm0, %v368_v48, 0.0 }
 0x514   :  { %373 = vadd.xlane.f32.xlu2 %v372_v49 }
 0x56e   :  { %v371_v54 = vpop.xlane.xlu2 %370 }
 0x56f   :  { %v375_v55 = vmul.f32 %v371_v54, %v1071_v10 }
 0x571   :  { %v377_v56 = vadd.f32 1e-05, %v375_v55 }
 0x573   :  { %874 = vrsqrt.f32 %v377_v56  ;;  %vm385_vm10 = vweird.f32 %v377_v56 }
 0x579   :  { %v875_v57 = vpop.eup %874 }
 0x57a   :  { %v380_v58 = vmul.f32 %v875_v57, %v377_v56  ;;  %vm386_vm9 = vweird.f32 %v875_v57 }
 0x57b   :  { %vm387_vm11 = vmor %vm385_vm10, %vm386_vm9 }
 0x57c   :  { %v381_v59 = vmul.f32 %v875_v57, %v380_v58  ;;  %v856_v58 = vld [vmem:[%s1323_s14] ss:$0 sm:$0xff] }
 0x57e   :  { %v382_v60 = vmul.f32 0.5, %v381_v59 }
 0x580   :  { %v383_v61 = vsub.f32 1.5, %v382_v60 }
 0x582   :  { %v384_v62 = vmul.f32 %v875_v57, %v383_v61 }
 0x584   :  { %v388_v0 = vsel %vm387_vm11, %v875_v57, %v384_v62 }
 0x585   :  { %v399_v3 = vmul.f32 %v388_v0, %v365_v42 }
 0x587   :  { %v374_v6 = vpop.xlane.xlu2 %373  ;;  %v404_v7 = vmul.f32 %v853_v63, %v399_v3 }
 0x588   :  { %v376_v8 = vmul.f32 %v374_v6, %v1071_v10 }
 0x589   :  { %v1180_v9 = vadd.f32 %v854_v4, %v404_v7 }
 0x58a   :  { %v378_v11 = vadd.f32 1e-05, %v376_v8 }
 0x58b   :  { %820 = vmatmul.msk.f32.vlgmr.msrb.gmra.mxu2 %vm76_vm0, %v1180_v9 }
 0x58c   :  { %876 = vrsqrt.f32 %v378_v11  ;;  %vm395_vm13 = vweird.f32 %v378_v11 }
 0x592   :  { %v877_v12 = vpop.eup %876 }
 0x593   :  { %v390_v13 = vmul.f32 %v877_v12, %v378_v11  ;;  %vm396_vm12 = vweird.f32 %v877_v12 }
 0x594   :  { %vm397_vm14 = vmor %vm395_vm13, %vm396_vm12 }
 0x595   :  { %v391_v14 = vmul.f32 %v877_v12, %v390_v13 }
 0x597   :  { %v392_v15 = vmul.f32 0.5, %v391_v14  ;;  %v570_v14 = vld [vmem:[%s1326_s17 + $0x18] sm:$0xff] }
 0x598   :  { %589 = vmatpush.msra.mxu3 %v570_v14 }
 0x599   :  { %v393_v16 = vsub.f32 1.5, %v392_v15  ;;  %v603_v15 = vld [vmem:[%s1327_s18 + $0x18] sm:$0xff] }
 0x59a   :  { %620 = vmatpush.msra.mxu1 %v603_v15 }
 0x59b   :  { %v394_v17 = vmul.f32 %v877_v12, %v393_v16  ;;  %v569_v16 = vld [vmem:[%s1326_s17 + $0x10] sm:$0xff] }
 0x59c   :  { %590 = vmatpush.msra.mxu3 %v569_v16 }
 0x59d   :  { %v398_v18 = vsel %vm397_vm14, %v877_v12, %v394_v17  ;;  %v602_v17 = vld [vmem:[%s1327_s18 + $0x10] sm:$0xff] }
 0x59e   :  { %v400_v19 = vmul.f32 %v398_v18, %v366_v47  ;;  %621 = vmatpush.msra.mxu1 %v602_v17  ;;  %v568_v18 = vld [vmem:[%s1326_s17 + $0x8] sm:$0xff] }
 0x59f   :  { %591 = vmatpush.msra.mxu3 %v568_v18 }
 0x5a0   :  { %v405_v20 = vmul.f32 %v853_v63, %v400_v19  ;;  %v601_v19 = vld [vmem:[%s1327_s18 + $0x8] sm:$0xff] }
 0x5a1   :  { %622 = vmatpush.msra.mxu1 %v601_v19 }
 0x5a2   :  { %v1184_v21 = vadd.f32 %v854_v4, %v405_v20  ;;  %v567_v20 = vld [vmem:[%s1326_s17] sm:$0xff]  ;;  %s941_s17 = smov 32  }
 0x5a3   :  { %592 = vmatpush.msra.mxu3 %v567_v20  ;;  %637 = vrot.lane.b32.xlu0 %v635_v28, %s941_s17 }
 0x5a4   :  { %821 = vmatmul.msk.f32.gmra.mxu2 %vm76_vm0, %v1184_v21 }
 0x60e   :  { %v442_v36 = vpop.f32.mrf.mxu2 }
 0x60f   :  { %v443_v37 = vadd.f32 %v855_v35, %v442_v36  ;;  %v858_v36 = vld [vmem:[%s1325_s16] ss:$0 sm:$0xff] }
 0x611   :  { %v448_v38 = vmul.f32 %v443_v37, %v443_v37 }
 0x613   :  { %v450_v39 = vmul.f32 %v448_v38, %v443_v37 }
 0x615   :  { %v452_v40 = vmul.f32 0.044715, %v450_v39 }
 0x617   :  { %v454_v41 = vadd.f32 %v452_v40, %v443_v37 }
 0x619   :  { %v456_v42 = vmul.f32 0.7978846, %v454_v41 }
 0x61b   :  { %878 = vtanh.f32 %v456_v42 }
 0x621   :  { %v879_v43 = vpop.eup %878 }
 0x622   :  { %v460_v44 = vadd.f32 1.0, %v879_v43 }
 0x624   :  { %v462_v45 = vmul.f32 0.5, %v460_v44 }
 0x626   :  { %v464_v46 = vmul.f32 %v462_v45, %v443_v37 }
 0x627   :  { %v445_v47 = vpop.f32.mrf.mxu2 }
 0x628   :  { %v446_v48 = vadd.f32 %v855_v35, %v445_v47  ;;  %502 = vmatmul.f32.vlgmr.msrb.gmra.mxu0 %v464_v46 }
 0x62a   :  { %v449_v49 = vmul.f32 %v446_v48, %v446_v48 }
 0x62c   :  { %v451_v50 = vmul.f32 %v449_v49, %v446_v48 }
 0x62e   :  { %v453_v51 = vmul.f32 0.044715, %v451_v50 }
 0x630   :  { %v455_v52 = vadd.f32 %v453_v51, %v446_v48  ;;  %v942_v51 = vmov 0  }
 0x631   :  { %844 = vset.pattern.permute.xlu0 %v942_v51  ;;  %845 = vset.pattern.permute.xlu2 %v942_v51 }
 0x632   :  { %v457_v53 = vmul.f32 0.7978846, %v455_v52  ;;  %846 = vset.pattern.permute.xlu1 %v942_v51  ;;  %v859_v52 = vld [vmem:[%s1328_s19] ss:$0 sm:$0xff] }
 0x634   :  { %880 = vtanh.f32 %v457_v53 }
 0x63a   :  { %v881_v54 = vpop.eup %880 }
 0x63b   :  { %v461_v55 = vadd.f32 1.0, %v881_v54 }
 0x63d   :  { %v463_v56 = vmul.f32 0.5, %v461_v55  ;;  %v632_v55 = vperm.slane %v631_v27, 0 }
 0x63f   :  { %v465_v57 = vmul.f32 %v463_v56, %v446_v48  ;;  %v638_v56 = vpop.permute.xlu0 %637 }
 0x641   :  { %505 = vmatmul.f32.gmra.mxu0 %v465_v57 }
 0x6a5   :  { %v503_v59 = vpop.f32.mrf.mxu0 }
 0x6a6   :  { %v504_v60 = vadd.f32 %v856_v58, %v503_v59 }
 0x6a8   :  { %v509_v61 = vadd.f32 %v504_v60, %v1180_v9 }
 0x6aa   :  { %v513_v62 = vsel %vm76_vm0, %v509_v61, 0.0 }
 0x6ab   :  { %514 = vadd.xlane.f32.xlu2 %v513_v62 }
 0x6be   :  { %v506_v63 = vpop.f32.mrf.mxu0 }
 0x6bf   :  { %v507_v0 = vadd.f32 %v856_v58, %v506_v63 }
 0x6c1   :  { %v510_v1 = vadd.f32 %v507_v0, %v1184_v21  ;;  %v600_v21 = vld [vmem:[%s1327_s18] sm:$0xff] }
 0x6c2   :  { %623 = vmatpush.msra.mxu1 %v600_v21 }
 0x6c3   :  { %v516_v2 = vsel %vm76_vm0, %v510_v1, 0.0 }
 0x6c4   :  { %517 = vadd.xlane.f32.xlu2 %v516_v2 }
 0x71e   :  { %v515_v3 = vpop.xlane.xlu2 %514 }
 0x71f   :  { %v519_v4 = vmul.f32 %v515_v3, %v1071_v10 }
 0x721   :  { %v521_v5 = vsub.f32 %v509_v61, %v519_v4 }
 0x723   :  { %v523_v6 = vmul.f32 %v521_v5, %v521_v5 }
 0x725   :  { %v525_v7 = vsel %vm76_vm0, %v523_v6, 0.0 }
 0x726   :  { %526 = vadd.xlane.f32.xlu2 %v525_v7 }
 0x737   :  { %v518_v8 = vpop.xlane.xlu2 %517 }
 0x738   :  { %v520_v9 = vmul.f32 %v518_v8, %v1071_v10 }
 0x73a   :  { %v522_v11 = vsub.f32 %v510_v1, %v520_v9 }
 0x73c   :  { %v524_v12 = vmul.f32 %v522_v11, %v522_v11 }
 0x73e   :  { %v528_v13 = vsel %vm76_vm0, %v524_v12, 0.0 }
 0x73f   :  { %529 = vadd.xlane.f32.xlu1 %v528_v13 }
 0x799   :  { %v527_v22 = vpop.xlane.xlu2 %526 }
 0x79a   :  { %v531_v23 = vmul.f32 %v527_v22, %v1071_v10 }
 0x79c   :  { %v533_v24 = vadd.f32 1e-05, %v531_v23 }
 0x79e   :  { %882 = vrsqrt.f32 %v533_v24  ;;  %vm541_vm1 = vweird.f32 %v533_v24 }
 0x7a4   :  { %v883_v25 = vpop.eup %882 }
 0x7a5   :  { %v536_v26 = vmul.f32 %v883_v25, %v533_v24  ;;  %vm542_vm15 = vweird.f32 %v883_v25 }
 0x7a6   :  { %vm543_vm2 = vmor %vm541_vm1, %vm542_vm15 }
 0x7a7   :  { %v537_v29 = vmul.f32 %v883_v25, %v536_v26 }
 0x7a9   :  { %v538_v30 = vmul.f32 0.5, %v537_v29 }
 0x7ab   :  { %v539_v31 = vsub.f32 1.5, %v538_v30 }
 0x7ad   :  { %v540_v32 = vmul.f32 %v883_v25, %v539_v31 }
 0x7af   :  { %v544_v34 = vsel %vm543_vm2, %v883_v25, %v540_v32 }
 0x7b0   :  { %v555_v35 = vmul.f32 %v544_v34, %v521_v5 }
 0x7b2   :  { %v560_v37 = vmul.f32 %v857_v33, %v555_v35  ;;  %v530_v38 = vpop.xlane.xlu1 %529 }
 0x7b3   :  { %v532_v39 = vmul.f32 %v530_v38, %v1071_v10 }
 0x7b4   :  { %v565_v40 = vadd.f32 %v858_v36, %v560_v37 }
 0x7b5   :  { %v534_v41 = vadd.f32 1e-05, %v532_v39  ;;  %v753_v39 = vld [vmem:[%s1349_s13 + $0x8] sm:$0xff] }
 0x7b6   :  { %822 = vmatmul.msk.f32.vlgmr.msra.gmra.mxu3 %vm76_vm0, %v565_v40  ;;  %824 = vmatmul.msk.f32.vlgmr.msra.gmra.mxu1 %vm76_vm0, %v565_v40 }
 0x7b7   :  { %884 = vrsqrt.f32 %v534_v41  ;;  %826 = vmatpush.xpose.msk.msra.mxu2 %vm76_vm0, %v565_v40  ;;  %vm551_vm4 = vweird.f32 %v534_v41 }
 0x7bd   :  { %v885_v42 = vpop.eup %884 }
 0x7be   :  { %v546_v43 = vmul.f32 %v885_v42, %v534_v41  ;;  %vm552_vm3 = vweird.f32 %v885_v42 }
 0x7bf   :  { %vm553_vm5 = vmor %vm551_vm4, %vm552_vm3 }
 0x7c0   :  { %v547_v44 = vmul.f32 %v885_v42, %v546_v43 }
 0x7c2   :  { %v548_v45 = vmul.f32 0.5, %v547_v44 }
 0x7c4   :  { %v549_v46 = vsub.f32 1.5, %v548_v45 }
 0x7c6   :  { %v550_v47 = vmul.f32 %v885_v42, %v549_v46 }
 0x7c8   :  { %v554_v48 = vsel %vm553_vm5, %v885_v42, %v550_v47 }
 0x7c9   :  { %v556_v10 = vmul.f32 %v554_v48, %v522_v11 }
 0x7cb   :  { %v561_v49 = vmul.f32 %v857_v33, %v556_v10 }
 0x7cd   :  { %v566_v50 = vadd.f32 %v858_v36, %v561_v49  ;;  %v752_v36 = vld [vmem:[%s1349_s13] sm:$0xff] }
 0x7cf   :  { %823 = vmatmul.msk.f32.gmra.mxu3 %vm76_vm0, %v566_v50  ;;  %825 = vmatmul.msk.f32.gmra.mxu1 %vm76_vm0, %v566_v50 }
 0x7d0   :  { %829 = vmatpush.xpose.msk.msrb.mxu3 %vm76_vm0, %v566_v50 }
 0x833   :  { %v625_v53 = vpop.f32.mrf.mxu1 }
 0x834   :  { %v626_v54 = vadd.f32 %v859_v52, %v625_v53 }
 0x836   :  { %650 = vrot.lane.b32.xlu0 %v626_v54, %s943_s20 }
 0x839   :  { %v594_v57 = vpop.f32.mrf.mxu3 }
 0x83a   :  { %v633_v58 = vadd.f32 %v632_v55, %v594_v57  ;;  %v640_v59 = vadd.f32 %v638_v56, %v594_v57 }
 0x83c   :  { %827 = vmatmul.msk.f32.vlgmr.msra.gmra.mxu2 %vm76_vm0, %v633_v58  ;;  %644 = vrot.lane.b32.xlu2 %v640_v59, %s939_s5 }
 0x83e   :  { %655 = vperm.xlu0 %844, %v626_v54  }
 0x84c   :  { %v628_v60 = vpop.f32.mrf.mxu1 }
 0x84d   :  { %v629_v61 = vadd.f32 %v859_v52, %v628_v60 }
 0x84f   :  { %652 = vrot.lane.b32.xlu2 %v629_v61, %s943_s20 }
 0x852   :  { %v597_v62 = vpop.f32.mrf.mxu3 }
 0x853   :  { %v634_v63 = vadd.f32 %v632_v55, %v597_v62  ;;  %v641_v0 = vadd.f32 %v638_v56, %v597_v62 }
 0x855   :  { %830 = vmatmul.msk.f32.vlgmr.msrb.gmra.mxu3 %vm76_vm0, %v634_v63  ;;  %646 = vrot.lane.b32.xlu1 %v641_v0, %s939_s5 }
 0x857   :  { %663 = vperm.xlu2 %845, %v629_v61  }
 0x896   :  { %v645_v1 = vpop.permute.xlu2 %644 }
 0x897   :  { %828 = vmatmul.msk.f32.gmra.mxu2 %vm76_vm0, %v645_v1 }
 0x8a8   :  { %v651_v2 = vpop.permute.xlu0 %650 }
 0x8a9   :  { %659 = vperm.xlu1 %846, %v651_v2   ;;  %v653_v3 = vpop.permute.xlu2 %652 }
 0x8b0   :  { %v656_v4 = vpop.permute.xlu0 %655 }
 0x8b1   :  { %667 = vperm.xlu1 %846, %v653_v3   ;;  %v664_v8 = vpop.permute.xlu2 %663 }
 0x8bf   :  { %v692_v5 = vpop.f32.mrf.mxu2 }
 0x8c0   :  { %v693_v6 = vadd.f32 %v692_v5, %v656_v4 }
 0x8c2   :  { %726 = vst.msk [vmem:[#allocation2] sm:$0xff] %vm241_vm8, %v693_v6 }
 0x8c7   :  { %v647_v7 = vpop.permute.xlu1 %646 }
 0x8c8   :  { %831 = vmatmul.msk.f32.gmra.mxu3 %vm76_vm0, %v647_v7 }
 0x8d8   :  { %v720_v9 = vpop.f32.mrf.mxu3 }
 0x8d9   :  { %v721_v11 = vadd.f32 %v720_v9, %v664_v8 }
 0x8db   :  { %728 = vst.msk [vmem:[#allocation2 + $0x10] sm:$0xff] %vm241_vm8, %v721_v11 }
 0x91a   :  { %v695_v12 = vpop.f32.mrf.mxu2 }
 0x91b   :  { %v660_v13 = vpop.permute.xlu1 %659 }
 0x91c   :  { %v696_v14 = vadd.f32 %v695_v12, %v660_v13 }
 0x91e   :  { %727 = vst.msk [vmem:[#allocation2 + $0x8] sm:$0xff] %vm241_vm8, %v696_v14  ;;  %v730_v15 = vmax.f32 %v693_v6, %v696_v14  ;;  %v754_v35 = vsub.f32 %v696_v14, %v693_v6 }
 0x920   :  { %v732_v16 = vsub.f32 %v693_v6, %v730_v15  ;;  %v738_v17 = vsub.f32 %v696_v14, %v730_v15  ;;  %v756_v40 = vmul.f32 %v754_v35, %v752_v36 }
 0x922   :  { %v734_v18 = vmul.f32 1.442695, %v732_v16  ;;  %v740_v19 = vmul.f32 1.442695, %v738_v17  ;;  %v758_v45 = vadd.f32 %v756_v40, %v693_v6 }
 0x923   :  { %v668_v20 = vpop.permute.xlu1 %667 }
 0x924   :  { %886 = vpow2.f32 %v734_v18 }
 0x925   :  { %888 = vpow2.f32 %v740_v19 }
 0x92a   :  { %v887_v23 = vpop.eup %886 }
 0x92b   :  { %v889_v25 = vpop.eup %888 }
 0x92c   :  { %v744_v30 = vadd.f32 %v889_v25, %v887_v23 }
 0x94b   :  { %v723_v21 = vpop.f32.mrf.mxu3 }
 0x94c   :  { %v724_v22 = vadd.f32 %v723_v21, %v668_v20 }
 0x94e   :  { %729 = vst.msk [vmem:[#allocation2 + $0x18] sm:$0xff] %vm241_vm8, %v724_v22  ;;  %v731_v24 = vmax.f32 %v721_v11, %v724_v22  ;;  %v755_v37 = vsub.f32 %v724_v22, %v721_v11 }
 0x94f   :  { %789 = dma.vmem_to_hbm [thread:$0]  %s782_s11, 512, %s784_s23, [#allocation3], %s945_s1, %s945_s1, %s946_s24  }
 0x950   :  { %v733_v26 = vsub.f32 %v721_v11, %v731_v24  ;;  %v739_v27 = vsub.f32 %v724_v22, %v731_v24  ;;  %v757_v42 = vmul.f32 %v755_v37, %v753_v39 }
 0x952   :  { %v736_v28 = vmul.f32 1.442695, %v733_v26  ;;  %v742_v29 = vmul.f32 1.442695, %v739_v27  ;;  %v759_v47 = vadd.f32 %v757_v42, %v721_v11 }
 0x954   :  { %890 = vpow2.f32 %v736_v28 }
 0x955   :  { %892 = vpow2.f32 %v742_v29 }
 0x956   :  { %894 = vlog2.f32 %v744_v30 }
 0x95a   :  { %v891_v31 = vpop.eup %890 }
 0x95b   :  { %v893_v32 = vpop.eup %892 }
 0x95c   :  { %v895_v33 = vpop.eup %894  ;;  %v745_v34 = vadd.f32 %v893_v32, %v891_v31 }
 0x95d   :  { %v747_v38 = vmul.f32 0.6931472, %v895_v33 }
 0x95e   :  { %896 = vlog2.f32 %v745_v34 }
 0x95f   :  { %v750_v41 = vadd.f32 %v747_v38, %v730_v15 }
 0x961   :  { %v760_v48 = vsub.f32 %v750_v41, %v758_v45 }
 0x963   :  { %v762_v49 = vsel %vm241_vm8, %v760_v48, 0.0 }
 0x964   :  { %v897_v43 = vpop.eup %896 }
 0x965   :  { %v749_v44 = vmul.f32 0.6931472, %v897_v43 }
 0x967   :  { %v751_v46 = vadd.f32 %v749_v44, %v731_v24 }
 0x969   :  { %v761_v10 = vsub.f32 %v751_v46, %v759_v47 }
 0x96b   :  { %v763_v50 = vsel %vm241_vm8, %v761_v10, 0.0 }
 0x96c   :  { %v764_v51 = vadd.f32 %v763_v50, %v762_v49 }
 0x96e   :  { %765 = vadd.xlane.f32.xlu2 %v764_v51 }
 0x9e1   :  { %v766_v52 = vpop.xlane.xlu2 %765 }
 0x9e2   :  { %v767_v53 = vrot.slane %v766_v52, 4 }
 0x9e4   :  { %v768_v54 = vadd.f32 %v767_v53, %v766_v52 }
 0x9e6   :  { %v769_v55 = vrot.slane %v768_v54, 2 }
 0x9e8   :  { %v770_v56 = vadd.f32 %v769_v55, %v768_v54 }
 0x9ea   :  { %v771_v57 = vrot.slane %v770_v56, 1 }
 0x9ec   :  { %v772_v58 = vadd.f32 %v771_v57, %v770_v56 }
 0x9ee   :  { %832 = vpush %v772_v58 }
 0xa1f   :  { %s833_s10 = spop %832 }
 0xa20   :  { %s774_s8 = smul.f32 0.0078125, %s833_s10 }
 0xa22   :  { %776 = sst [smem:[#allocation5]] %s774_s8 }
 0xa23   :  { %798 = dma.smem_to_hbm %s947_s21, 16, %s796_s9, [#allocation4]  }
 0xa24   :  { %934 = dma.done.wait [#allocation3], 512  }
 0xa25   :  { %935 = vsyncadd [#allocation3], 4294966784 }
 0xa26   :  { %936 = dma.done.wait [#allocation4], 16  }
 0xa27   :  { %937 = vsyncadd [#allocation4], 4294967280 }
 0xa28   :  { %807 = sfence }
 0xa29   :  { %808 = vsyncpa [#allocation3], 1 }
 0xa2a   :  { %809 = vsyncpa [#allocation4], 1 }

</bundles_post_ra>
